<compile_context>
chip_gen: v5e
topology: v5e:2x2
jax: 0.10.0
libtpu: 0.0.40
codegen_flags: <defaults>
</compile_context>

<pallas_src>
import jax
import jax.numpy as jnp
from jax.experimental import pallas as pl
from jax.experimental.pallas import tpu as pltpu

HIDDEN = 2000  # fixed by the module: Linear(embedding_features, 2000)


def _decoder_kernel(x_ref, w1_ref, b1_ref, w2_ref, b2_ref, o_ref):
    # Layer 1: (B, E) @ (E, H) on the bf16 MXU path, f32 accumulate.
    h = jnp.dot(x_ref[...], w1_ref[...], preferred_element_type=jnp.float32)
    h = jnp.tanh(h + b1_ref[...])                                  # (B, H) f32, EUP tanh

    # Layer 2: (B, H) @ (H, F), f32 accumulate.
    y = jnp.dot(h.astype(jnp.bfloat16), w2_ref[...],
                preferred_element_type=jnp.float32)
    y = y + b2_ref[...]                                            # (B, F) f32

    # Exact sigmoid via one EUP tanh: sigmoid(y) = 0.5 * (tanh(y/2) + 1).
    o_ref[...] = (0.5 * (jnp.tanh(0.5 * y) + 1.0)).astype(o_ref.dtype)


@jax.jit
def decoder_forward(x, w1, b1, w2, b2):
    """x: (B, E) f32/bf16; w1: (E, H) bf16; b1: (1, H) f32;
    w2: (H, F) bf16; b2: (1, F) f32.  Returns (B, F) f32."""
    B, _ = x.shape
    F = w2.shape[1]
    x = x.astype(jnp.bfloat16)  # one cast in the wrapper, not inside the kernel

    vmem_spec = pl.BlockSpec(memory_space=pltpu.MemorySpace.VMEM)
    return pl.pallas_call(
        _decoder_kernel,
        out_shape=jax.ShapeDtypeStruct((B, F), jnp.float32),
        in_specs=[vmem_spec] * 5,
        out_specs=vmem_spec,
        compiler_params=pltpu.CompilerParams(
            # ~0.5 MiB actually used; comfortably under v7x's 32 MiB scoped /
            # 64 MiB physical VMEM as well as v5e/v6e limits.  Re-derive tiling
            # if E or F ever grow enough that 2*(E*H + H*F)*2 B stops fitting.
            vmem_limit_bytes=16 * 1024 * 1024,
        ),
    )(x, w1, b1, w2, b2)


def init_decoder_params(key, embedding_features, in_features):
    """Deterministic init mimicking torch.nn.Linear (uniform +/- 1/sqrt(fan_in)).

    Returns unpadded f32 params stored as (in, out) == transpose of torch's
    (out, in) weight layout.
    """
    k1, k2, k3, k4 = jax.random.split(key, 4)
    bound1 = 1.0 / jnp.sqrt(jnp.float32(embedding_features))
    bound2 = 1.0 / jnp.sqrt(jnp.float32(HIDDEN))
    w1 = jax.random.uniform(k1, (embedding_features, HIDDEN), jnp.float32, -bound1, bound1)
    b1 = jax.random.uniform(k2, (1, HIDDEN), jnp.float32, -bound1, bound1)
    w2 = jax.random.uniform(k3, (HIDDEN, in_features), jnp.float32, -bound2, bound2)
    b2 = jax.random.uniform(k4, (1, in_features), jnp.float32, -bound2, bound2)
    return w1, b1, w2, b2


def prepare_params(w1, b1, w2, b2):
    """Cast weights to bf16 for the kernel (no padding needed anymore)."""
    return w1.astype(jnp.bfloat16), b1, w2.astype(jnp.bfloat16), b2


def decoder_reference(x, w1, b1, w2, b2):
    """Pure-JAX f32 reference with the original (unpadded, f32) parameters."""
    h = jnp.tanh(x @ w1 + b1)
    return jax.nn.sigmoid(h @ w2 + b2)


if __name__ == "__main__":
    key = jax.random.PRNGKey(0)
    kx, kp = jax.random.split(key)

    batch = 8
    embedding_features = 32
    in_features = 64

    x = jax.random.normal(kx, (batch, embedding_features), jnp.float32)
    w1, b1, w2, b2 = init_decoder_params(kp, embedding_features, in_features)
    w1_k, b1_k, w2_k, b2_k = prepare_params(w1, b1, w2, b2)

    out = decoder_forward(x, w1_k, b1_k, w2_k, b2_k)
    out = jax.block_until_ready(out)

    ref = decoder_reference(x, w1, b1, w2, b2)
    assert out.shape == (batch, in_features)
    # bf16 weights + bf16 x vs. the pure-f32 reference -> relaxed tolerance.
    assert jnp.allclose(out, ref, atol=5e-3, rtol=0.0), "mismatch vs reference"

    # TODO(synk): for steady-state repeated decode, keep the ~400 KB of weights
    # VMEM-resident across calls (fuse into the caller's pallas_call or use a
    # cross-pallas_call prefetch) instead of re-streaming them per invocation;
    # on v7x, add a 'parallel' batch axis once B is large enough to use both TCs.
    print("KERNEL_OK")
</pallas_src>

<mosaic_0001>
module attributes {stable_mosaic.version = 11 : i64} {
  func.func @_decoder_kernel(%arg0: memref<8x32xbf16, #tpu.memory_space<vmem>>, %arg1: memref<32x2000xbf16, #tpu.memory_space<vmem>>, %arg2: memref<1x2000xf32, #tpu.memory_space<vmem>>, %arg3: memref<2000x64xbf16, #tpu.memory_space<vmem>>, %arg4: memref<1x64xf32, #tpu.memory_space<vmem>>, %arg5: memref<8x64xf32, #tpu.memory_space<vmem>>) attributes {dimension_semantics = [], scalar_prefetch = 0 : i64, scratch_operands = 0 : i64, tpu.core_type = #tpu.core_type<tc>} {
    %c0 = arith.constant 0 : index
    %c0_0 = arith.constant 0 : index
    %0 = vector.load %arg0[%c0, %c0_0] : memref<8x32xbf16, #tpu.memory_space<vmem>>, vector<8x32xbf16>
    %c0_1 = arith.constant 0 : index
    %c0_2 = arith.constant 0 : index
    %1 = vector.load %arg1[%c0_1, %c0_2] : memref<32x2000xbf16, #tpu.memory_space<vmem>>, vector<32x2000xbf16>
    %cst = arith.constant dense<0.000000e+00> : vector<8x2000xf32>
    %2 = tpu.matmul %0, %1, %cst {dimension_numbers = #tpu.dot_dimension_numbers<[1], [0], [0], [1], [0, 0, 1, 1], [], []>} : vector<8x32xbf16>, vector<32x2000xbf16>, vector<8x2000xf32> -> vector<8x2000xf32>
    %c0_3 = arith.constant 0 : index
    %c0_4 = arith.constant 0 : index
    %3 = vector.load %arg2[%c0_3, %c0_4] : memref<1x2000xf32, #tpu.memory_space<vmem>>, vector<1x2000xf32>
    %4 = vector.broadcast %3 : vector<1x2000xf32> to vector<8x2000xf32>
    %5 = arith.addf %2, %4 : vector<8x2000xf32>
    %6 = math.tanh %5 : vector<8x2000xf32>
    %7 = arith.truncf %6 : vector<8x2000xf32> to vector<8x2000xbf16>
    %c0_5 = arith.constant 0 : index
    %c0_6 = arith.constant 0 : index
    %8 = vector.load %arg3[%c0_5, %c0_6] : memref<2000x64xbf16, #tpu.memory_space<vmem>>, vector<2000x64xbf16>
    %cst_7 = arith.constant dense<0.000000e+00> : vector<8x64xf32>
    %9 = tpu.matmul %7, %8, %cst_7 {dimension_numbers = #tpu.dot_dimension_numbers<[1], [0], [0], [1], [0, 0, 1, 1], [], []>} : vector<8x2000xbf16>, vector<2000x64xbf16>, vector<8x64xf32> -> vector<8x64xf32>
    %c0_8 = arith.constant 0 : index
    %c0_9 = arith.constant 0 : index
    %10 = vector.load %arg4[%c0_8, %c0_9] : memref<1x64xf32, #tpu.memory_space<vmem>>, vector<1x64xf32>
    %11 = vector.broadcast %10 : vector<1x64xf32> to vector<8x64xf32>
    %12 = arith.addf %9, %11 : vector<8x64xf32>
    %cst_10 = arith.constant 5.000000e-01 : f32
    %13 = vector.broadcast %cst_10 : f32 to vector<8x64xf32>
    %14 = arith.mulf %13, %12 : vector<8x64xf32>
    %15 = math.tanh %14 : vector<8x64xf32>
    %cst_11 = arith.constant 1.000000e+00 : f32
    %16 = vector.broadcast %cst_11 : f32 to vector<8x64xf32>
    %17 = arith.addf %15, %16 : vector<8x64xf32>
    %cst_12 = arith.constant 5.000000e-01 : f32
    %18 = vector.broadcast %cst_12 : f32 to vector<8x64xf32>
    %19 = arith.mulf %18, %17 : vector<8x64xf32>
    %c0_13 = arith.constant 0 : index
    %c0_14 = arith.constant 0 : index
    %20 = vector.load %arg5[%c0_13, %c0_14] : memref<8x64xf32, #tpu.memory_space<vmem>>, vector<8x64xf32>
    tpu.vector_store %arg5[%c0_13, %c0_14], %19 {strides = array<i32>} : memref<8x64xf32, #tpu.memory_space<vmem>>, vector<8x64xf32>,
    return
  }
}

</mosaic_0001>

<bundles_post_ra>
// kernel: decoder_forward.1
= control target key start
LH: loop header
LB: loop body
LE: loop exit
PB: predicated region body
PF: predicated region fallthrough
CT: control target
= control target key end

     0   :  { %vm251_vm0 = vcmask 261120   ;;  %s3264_s0 = inlined_call_operand.vmem [shape: bf16[8,32], index: 0, kind: input, shape index: {}]   ;;  %s3265_s1 = inlined_call_operand.vmem [shape: bf16[32,2000], index: 1, kind: input, shape index: {}]   ;;  %s3266_s2 = inlined_call_operand.vmem [shape: f32[1,2000], index: 2, kind: input, shape index: {}]   ;;  %s3267_s3 = inlined_call_operand.vmem [shape: bf16[2000,64], index: 3, kind: input, shape index: {}]   ;;  %s3268_s4 = inlined_call_operand.vmem [shape: f32[1,64], index: 4, kind: input, shape index: {}]   ;;  %s3269_s5 = inlined_call_operand.hbm [shape: f32[8,64], index: 5, kind: output, shape index: {}]  }
   0x1   :  { %v1799_v0 = vld [vmem:[%s3265_s1 + $0x80] sm:$0xf]  ;;  %v1807_v2 = vld [vmem:[%s3265_s1 + $0x88] sm:$0xf]  ;;  %v2394_v5 = vld [vmem:[%s3265_s1 + $0x84] sm:$0xf] }
   0x2   :  { %v2402_v1 = vld [vmem:[%s3265_s1 + $0xbc] sm:$0xf0]  ;;  %v2403_v4 = vld [vmem:[%s3265_s1 + $0xc4] sm:$0xf0]  ;;  %v1801_v6 = vld [vmem:[%s3265_s1 + $0xc0] sm:$0xf0] }
   0x3   :  { %v1800_v3 = vor.u32 %v2402_v1, %v1799_v0  ;;  %v1808_v7 = vor.u32 %v2403_v4, %v1807_v2  ;;  %v1804_v8 = vor.u32 %v2394_v5, %v1801_v6  ;;  %v2395_v9 = vld [vmem:[%s3265_s1 + $0x8c] sm:$0xf]  ;;  %v1735_v11 = vld [vmem:[%s3265_s1] sm:$0xf]  ;;  %v1743_v14 = vld [vmem:[%s3265_s1 + $0x8] sm:$0xf] }
   0x4   :  { %v1809_v10 = vld [vmem:[%s3265_s1 + $0xc8] sm:$0xf0]  ;;  %v2386_v13 = vld [vmem:[%s3265_s1 + $0x3c] sm:$0xf0]  ;;  %v2387_v15 = vld [vmem:[%s3265_s1 + $0x44] sm:$0xf0] }
   0x5   :  { %261 = vmatpush.bf16.msra.mxu0 %v1800_v3  ;;  %v1812_v12 = vor.u32 %v2395_v9, %v1809_v10  ;;  %287 = vmatpush.bf16.msra.mxu2 %v1808_v7  ;;  %v1736_v16 = vor.u32 %v2386_v13, %v1735_v11  ;;  %v1744_v17 = vor.u32 %v2387_v15, %v1743_v14  ;;  %v2378_v18 = vld [vmem:[%s3265_s1 + $0x4] sm:$0xf]  ;;  %v2379_v20 = vld [vmem:[%s3265_s1 + $0xc] sm:$0xf]  ;;  %v2679_v23 = vld [vmem:[%s3264_s0] sm:$0xf] }
   0x6   :  { %274 = vmatpush.bf16.msra.mxu1 %v1804_v8  ;;  %v1737_v19 = vld [vmem:[%s3265_s1 + $0x40] sm:$0xf0]  ;;  %v1745_v22 = vld [vmem:[%s3265_s1 + $0x48] sm:$0xf0]  ;;  %v1815_v25 = vld [vmem:[%s3265_s1 + $0x90] sm:$0xf] }
   0x7   :  { %300 = vmatpush.bf16.msra.mxu3 %v1812_v12  ;;  %v1740_v21 = vor.u32 %v2378_v18, %v1737_v19  ;;  %v1748_v24 = vor.u32 %v2379_v20, %v1745_v22  ;;  %v2404_v26 = vld [vmem:[%s3265_s1 + $0xcc] sm:$0xf0]  ;;  %v1823_v27 = vld [vmem:[%s3265_s1 + $0x98] sm:$0xf]  ;;  %v2396_v30 = vld [vmem:[%s3265_s1 + $0x94] sm:$0xf] }
   0x8   :  { %v1816_v28 = vor.u32 %v2404_v26, %v1815_v25  ;;  %v2405_v29 = vld [vmem:[%s3265_s1 + $0xd4] sm:$0xf0]  ;;  %v1817_v31 = vld [vmem:[%s3265_s1 + $0xd0] sm:$0xf0]  ;;  %v2397_v34 = vld [vmem:[%s3265_s1 + $0x9c] sm:$0xf] }
   0x9   :  { %262 = vmatpush.bf16.msra.mxu0 %v1736_v16  ;;  %288 = vmatpush.bf16.msra.mxu2 %v1744_v17  ;;  %v1824_v32 = vor.u32 %v2405_v29, %v1823_v27  ;;  %v1820_v33 = vor.u32 %v2396_v30, %v1817_v31  ;;  %v1825_v35 = vld [vmem:[%s3265_s1 + $0xd8] sm:$0xf0]  ;;  %v1751_v36 = vld [vmem:[%s3265_s1 + $0x10] sm:$0xf]  ;;  %v1759_v39 = vld [vmem:[%s3265_s1 + $0x18] sm:$0xf] }
   0xa   :  { %275 = vmatpush.bf16.msra.mxu1 %v1740_v21  ;;  %v1828_v37 = vor.u32 %v2397_v34, %v1825_v35  ;;  %v2388_v38 = vld [vmem:[%s3265_s1 + $0x4c] sm:$0xf0]  ;;  %v2389_v40 = vld [vmem:[%s3265_s1 + $0x54] sm:$0xf0]  ;;  %v2380_v43 = vld [vmem:[%s3265_s1 + $0x14] sm:$0xf] }
   0xb   :  { %301 = vmatpush.bf16.msra.mxu3 %v1748_v24  ;;  %v1752_v41 = vor.u32 %v2388_v38, %v1751_v36  ;;  %v1760_v42 = vor.u32 %v2389_v40, %v1759_v39  ;;  %v1753_v44 = vld [vmem:[%s3265_s1 + $0x50] sm:$0xf0]  ;;  %v2381_v45 = vld [vmem:[%s3265_s1 + $0x1c] sm:$0xf]  ;;  %v1831_v47 = vld [vmem:[%s3265_s1 + $0xa0] sm:$0xf] }
   0xc   :  { %1861 = vmatmul.msk.bf16.vlgmr.msra.gmra.mxu0 %vm251_vm0, %v2679_v23  ;;  %1863 = vmatmul.msk.bf16.vlgmr.msra.gmra.mxu2 %vm251_vm0, %v2679_v23  ;;  %v1761_v46 = vld [vmem:[%s3265_s1 + $0x58] sm:$0xf0]  ;;  %v2406_v48 = vld [vmem:[%s3265_s1 + $0xdc] sm:$0xf0]  ;;  %v1756_v49 = vor.u32 %v2380_v43, %v1753_v44  ;;  %v1839_v51 = vld [vmem:[%s3265_s1 + $0xa8] sm:$0xf] }
   0xd   :  { %313 = vmatpush.bf16.msrb.mxu0 %v1816_v28  ;;  %339 = vmatpush.bf16.msrb.mxu2 %v1824_v32  ;;  %v1832_v50 = vor.u32 %v2406_v48, %v1831_v47  ;;  %v2407_v52 = vld [vmem:[%s3265_s1 + $0xe4] sm:$0xf0]  ;;  %v2398_v53 = vld [vmem:[%s3265_s1 + $0xa4] sm:$0xf]  ;;  %v1764_v54 = vor.u32 %v2381_v45, %v1761_v46  ;;  %v2399_v57 = vld [vmem:[%s3265_s1 + $0xac] sm:$0xf] }
   0xe   :  { %1862 = vmatmul.msk.bf16.vlgmr.msra.gmra.mxu1 %vm251_vm0, %v2679_v23  ;;  %1864 = vmatmul.msk.bf16.vlgmr.msra.gmra.mxu3 %vm251_vm0, %v2679_v23  ;;  %v1840_v55 = vor.u32 %v2407_v52, %v1839_v51  ;;  %v1833_v56 = vld [vmem:[%s3265_s1 + $0xe0] sm:$0xf0]  ;;  %v1841_v58 = vld [vmem:[%s3265_s1 + $0xe8] sm:$0xf0]  ;;  %v1767_v61 = vld [vmem:[%s3265_s1 + $0x20] sm:$0xf] }
   0xf   :  { %326 = vmatpush.bf16.msrb.mxu1 %v1820_v33  ;;  %352 = vmatpush.bf16.msrb.mxu3 %v1828_v37  ;;  %v1836_v59 = vor.u32 %v2398_v53, %v1833_v56  ;;  %v1844_v60 = vor.u32 %v2399_v57, %v1841_v58  ;;  %v2390_v62 = vld [vmem:[%s3265_s1 + $0x5c] sm:$0xf0]  ;;  %v1775_v63 = vld [vmem:[%s3265_s1 + $0x28] sm:$0xf]  ;;  %v2382_v2 = vld [vmem:[%s3265_s1 + $0x24] sm:$0xf] }
  0x10   :  { %v1768_v0 = vor.u32 %v2390_v62, %v1767_v61  ;;  %v2391_v1 = vld [vmem:[%s3265_s1 + $0x64] sm:$0xf0]  ;;  %v1769_v3 = vld [vmem:[%s3265_s1 + $0x60] sm:$0xf0]  ;;  %v2383_v5 = vld [vmem:[%s3265_s1 + $0x2c] sm:$0xf] }
  0x11   :  { %314 = vmatpush.bf16.msrb.mxu0 %v1752_v41  ;;  %340 = vmatpush.bf16.msrb.mxu2 %v1760_v42  ;;  %v1776_v4 = vor.u32 %v2391_v1, %v1775_v63  ;;  %v1777_v6 = vld [vmem:[%s3265_s1 + $0x68] sm:$0xf0]  ;;  %v1772_v7 = vor.u32 %v2382_v2, %v1769_v3 }
  0x12   :  { %v1780_v8 = vor.u32 %v2383_v5, %v1777_v6 }
  0x13   :  { %327 = vmatpush.bf16.msrb.mxu1 %v1756_v49  ;;  %353 = vmatpush.bf16.msrb.mxu3 %v1764_v54 }
  0x15   :  { %365 = vmatpush.bf16.msra.mxu0 %v1832_v50  ;;  %391 = vmatpush.bf16.msra.mxu2 %v1840_v55 }
  0x17   :  { %378 = vmatpush.bf16.msra.mxu1 %v1836_v59  ;;  %404 = vmatpush.bf16.msra.mxu3 %v1844_v60 }
  0x19   :  { %366 = vmatpush.bf16.msra.mxu0 %v1768_v0  ;;  %392 = vmatpush.bf16.msra.mxu2 %v1776_v4 }
  0x1a   :  { %10 = vsyncpa [#allocation3], 0  ;;  %v1855_v9 = vld [vmem:[%s3265_s1 + $0xb8] sm:$0xf]  ;;  %v2401_v11 = vld [vmem:[%s3265_s1 + $0xbc] sm:$0xf] }
  0x1b   :  { %379 = vmatpush.bf16.msra.mxu1 %v1772_v7  ;;  %v2409_v10 = vld [vmem:[%s3265_s1 + $0xf4] sm:$0xf0]  ;;  %405 = vmatpush.bf16.msra.mxu3 %v1780_v8  ;;  %v1857_v12 = vld [vmem:[%s3265_s1 + $0xf8] sm:$0xf0]  ;;  %v1847_v13 = vld [vmem:[%s3265_s1 + $0xb0] sm:$0xf] }
  0x1c   :  { %v2408_v14 = vld [vmem:[%s3265_s1 + $0xec] sm:$0xf0]  ;;  %v1856_v15 = vor.u32 %v2409_v10, %v1855_v9  ;;  %v1860_v16 = vor.u32 %v2401_v11, %v1857_v12  ;;  %v1791_v17 = vld [vmem:[%s3265_s1 + $0x38] sm:$0xf]  ;;  %1865 = vmatmul.msk.bf16.vlgmr.msrb.gmra.mxu0 %vm251_vm0, %v2679_v23  ;;  %v2385_v20 = vld [vmem:[%s3265_s1 + $0x3c] sm:$0xf]  ;;  %1867 = vmatmul.msk.bf16.vlgmr.msrb.gmra.mxu2 %vm251_vm0, %v2679_v23 }
  0x1d   :  { %v2393_v18 = vld [vmem:[%s3265_s1 + $0x74] sm:$0xf0]  ;;  %v1848_v19 = vor.u32 %v2408_v14, %v1847_v13  ;;  %v1793_v21 = vld [vmem:[%s3265_s1 + $0x78] sm:$0xf0]  ;;  %v2400_v22 = vld [vmem:[%s3265_s1 + $0xb4] sm:$0xf] }
  0x1e   :  { %1866 = vmatmul.msk.bf16.vlgmr.msrb.gmra.mxu1 %vm251_vm0, %v2679_v23  ;;  %v1849_v24 = vld [vmem:[%s3265_s1 + $0xf0] sm:$0xf0]  ;;  %1868 = vmatmul.msk.bf16.vlgmr.msrb.gmra.mxu3 %vm251_vm0, %v2679_v23  ;;  %v1792_v25 = vor.u32 %v2393_v18, %v1791_v17  ;;  %v1783_v27 = vld [vmem:[%s3265_s1 + $0x30] sm:$0xf]  ;;  %v1796_v30 = vor.u32 %v2385_v20, %v1793_v21  ;;  %v2417_v34 = vld [vmem:[%s3267_s3 + $0x38] sm:$0xff]  ;;  %vm1499_vm1 = vcmask 654336  }
  0x1f   :  { %443 = vmatpush.bf16.msrb.mxu2 %v1856_v15  ;;  %v1852_v26 = vor.u32 %v2400_v22, %v1849_v24  ;;  %v2392_v28 = vld [vmem:[%s3265_s1 + $0x6c] sm:$0xf0]  ;;  %v2384_v29 = vld [vmem:[%s3265_s1 + $0x34] sm:$0xf]  ;;  %456 = vmatpush.bf16.msrb.mxu3 %v1860_v16  ;;  %v2425_v35 = vld [vmem:[%s3267_s3 + $0x78] sm:$0xff]  ;;  %s1724_s29 = sshll.u32 %s3269_s5, 4  ;;  %s1725_s29 = int_to_ptr.hbm [resolvable:$true] %s1724_s29 }
  0x20   :  { %417 = vmatpush.bf16.msrb.mxu0 %v1848_v19  ;;  %v1784_v31 = vor.u32 %v2392_v28, %v1783_v27  ;;  %v1785_v32 = vld [vmem:[%s3265_s1 + $0x70] sm:$0xf0]  ;;  %v2433_v36 = vld [vmem:[%s3267_s3 + $0xb8] sm:$0xff]  ;;  %v2415_v42 = vld [vmem:[%s3267_s3 + $0x28] sm:$0xff]  ;;  %vm1715_vm2 = vcmask 523264  }
  0x21   :  { %430 = vmatpush.bf16.msrb.mxu1 %v1852_v26  ;;  %v1788_v33 = vor.u32 %v2384_v29, %v1785_v32  ;;  %v2441_v37 = vld [vmem:[%s3267_s3 + $0xf8] sm:$0xff]  ;;  %v2416_v38 = vld [vmem:[%s3267_s3 + $0x30] sm:$0xff]  ;;  %v2423_v43 = vld [vmem:[%s3267_s3 + $0x68] sm:$0xff] }
  0x22   :  { %v2424_v39 = vld [vmem:[%s3267_s3 + $0x70] sm:$0xff]  ;;  %v2431_v44 = vld [vmem:[%s3267_s3 + $0xa8] sm:$0xff]  ;;  %v2414_v46 = vld [vmem:[%s3267_s3 + $0x20] sm:$0xff] }
  0x23   :  { %444 = vmatpush.bf16.msrb.mxu2 %v1792_v25  ;;  %457 = vmatpush.bf16.msrb.mxu3 %v1796_v30  ;;  %v2432_v40 = vld [vmem:[%s3267_s3 + $0xb0] sm:$0xff]  ;;  %v2439_v45 = vld [vmem:[%s3267_s3 + $0xe8] sm:$0xff]  ;;  %v2422_v47 = vld [vmem:[%s3267_s3 + $0x60] sm:$0xff] }
  0x24   :  { %418 = vmatpush.bf16.msrb.mxu0 %v1784_v31  ;;  %v2440_v41 = vld [vmem:[%s3267_s3 + $0xf0] sm:$0xff]  ;;  %v2430_v48 = vld [vmem:[%s3267_s3 + $0xa0] sm:$0xff]  ;;  %v2413_v50 = vld [vmem:[%s3267_s3 + $0x18] sm:$0xff] }
  0x25   :  { %431 = vmatpush.bf16.msrb.mxu1 %v1788_v33  ;;  %v2438_v49 = vld [vmem:[%s3267_s3 + $0xe0] sm:$0xff]  ;;  %v2421_v51 = vld [vmem:[%s3267_s3 + $0x58] sm:$0xff]  ;;  %v2412_v54 = vld [vmem:[%s3267_s3 + $0x10] sm:$0xff] }
  0x26   :  { %v2429_v52 = vld [vmem:[%s3267_s3 + $0x98] sm:$0xff]  ;;  %v2420_v55 = vld [vmem:[%s3267_s3 + $0x50] sm:$0xff]  ;;  %v2411_v57 = vld [vmem:[%s3267_s3 + $0x8] sm:$0xff] }
  0x27   :  { %v2437_v53 = vld [vmem:[%s3267_s3 + $0xd8] sm:$0xff]  ;;  %v2428_v56 = vld [vmem:[%s3267_s3 + $0x90] sm:$0xff]  ;;  %v2419_v58 = vld [vmem:[%s3267_s3 + $0x48] sm:$0xff] }
  0x28   :  { %v2427_v59 = vld [vmem:[%s3267_s3 + $0x88] sm:$0xff]  ;;  %v2410_v61 = vld [vmem:[%s3267_s3] sm:$0xff]  ;;  %v2449_v62 = vld [vmem:[%s3267_s3 + $0x138] sm:$0xff] }
  0x29   :  { %v2435_v60 = vld [vmem:[%s3267_s3 + $0xc8] sm:$0xff]  ;;  %v2418_v63 = vld [vmem:[%s3267_s3 + $0x40] sm:$0xff]  ;;  %v2457_v0 = vld [vmem:[%s3267_s3 + $0x178] sm:$0xff] }
  0x2a   :  { %v2426_v1 = vld [vmem:[%s3267_s3 + $0x80] sm:$0xff]  ;;  %v2465_v2 = vld [vmem:[%s3267_s3 + $0x1b8] sm:$0xff]  ;;  %v2448_v5 = vld [vmem:[%s3267_s3 + $0x130] sm:$0xff] }
  0x2b   :  { %v2434_v3 = vld [vmem:[%s3267_s3 + $0xc0] sm:$0xff]  ;;  %v2473_v4 = vld [vmem:[%s3267_s3 + $0x1f8] sm:$0xff]  ;;  %v2456_v6 = vld [vmem:[%s3267_s3 + $0x170] sm:$0xff] }
  0x2c   :  { %1869 = vmatmul.msk.bf16.vlgmr.msra.gmra.mxu0 %vm251_vm0, %v2679_v23  ;;  %1871 = vmatmul.msk.bf16.vlgmr.msra.gmra.mxu2 %vm251_vm0, %v2679_v23  ;;  %v2464_v7 = vld [vmem:[%s3267_s3 + $0x1b0] sm:$0xff]  ;;  %v2447_v9 = vld [vmem:[%s3267_s3 + $0x128] sm:$0xff]  ;;  %v2446_v12 = vld [vmem:[%s3267_s3 + $0x120] sm:$0xff] }
  0x2d   :  { %1503 = vmatpush.bf16.msra.mxu0 %v2417_v34  ;;  %1529 = vmatpush.bf16.msra.mxu2 %v2433_v36  ;;  %v2472_v8 = vld [vmem:[%s3267_s3 + $0x1f0] sm:$0xff]  ;;  %v2455_v10 = vld [vmem:[%s3267_s3 + $0x168] sm:$0xff]  ;;  %v2454_v13 = vld [vmem:[%s3267_s3 + $0x160] sm:$0xff] }
  0x2e   :  { %1870 = vmatmul.msk.bf16.vlgmr.msra.gmra.mxu1 %vm251_vm0, %v2679_v23  ;;  %1872 = vmatmul.msk.bf16.vlgmr.msra.gmra.mxu3 %vm251_vm0, %v2679_v23  ;;  %v2463_v11 = vld [vmem:[%s3267_s3 + $0x1a8] sm:$0xff]  ;;  %v2445_v14 = vld [vmem:[%s3267_s3 + $0x118] sm:$0xff]  ;;  %v2462_v17 = vld [vmem:[%s3267_s3 + $0x1a0] sm:$0xff] }
  0x2f   :  { %1516 = vmatpush.bf16.msra.mxu1 %v2425_v35  ;;  %1542 = vmatpush.bf16.msra.mxu3 %v2441_v37  ;;  %v2471_v15 = vld [vmem:[%s3267_s3 + $0x1e8] sm:$0xff]  ;;  %v2453_v16 = vld [vmem:[%s3267_s3 + $0x158] sm:$0xff]  ;;  %v2444_v18 = vld [vmem:[%s3267_s3 + $0x110] sm:$0xff] }
  0x30   :  { %v2470_v19 = vld [vmem:[%s3267_s3 + $0x1e0] sm:$0xff]  ;;  %v2452_v20 = vld [vmem:[%s3267_s3 + $0x150] sm:$0xff]  ;;  %v2461_v21 = vld [vmem:[%s3267_s3 + $0x198] sm:$0xff] }
  0x31   :  { %1504 = vmatpush.bf16.msra.mxu0 %v2416_v38  ;;  %1530 = vmatpush.bf16.msra.mxu2 %v2432_v40  ;;  %v2443_v22 = vld [vmem:[%s3267_s3 + $0x108] sm:$0xff]  ;;  %v2469_v24 = vld [vmem:[%s3267_s3 + $0x1d8] sm:$0xff]  ;;  %v2460_v26 = vld [vmem:[%s3267_s3 + $0x190] sm:$0xff] }
  0x32   :  { %v2451_v25 = vld [vmem:[%s3267_s3 + $0x148] sm:$0xff]  ;;  %v2442_v27 = vld [vmem:[%s3267_s3 + $0x100] sm:$0xff]  ;;  %v2468_v28 = vld [vmem:[%s3267_s3 + $0x1d0] sm:$0xff] }
  0x33   :  { %1517 = vmatpush.bf16.msra.mxu1 %v2424_v39  ;;  %1543 = vmatpush.bf16.msra.mxu3 %v2440_v41  ;;  %v2450_v29 = vld [vmem:[%s3267_s3 + $0x140] sm:$0xff]  ;;  %v2459_v30 = vld [vmem:[%s3267_s3 + $0x188] sm:$0xff] }
  0x34   :  { %v2467_v31 = vld [vmem:[%s3267_s3 + $0x1c8] sm:$0xff]  ;;  %v2458_v32 = vld [vmem:[%s3267_s3 + $0x180] sm:$0xff] }
  0x35   :  { %1505 = vmatpush.bf16.msra.mxu0 %v2415_v42  ;;  %1531 = vmatpush.bf16.msra.mxu2 %v2431_v44  ;;  %v2466_v33 = vld [vmem:[%s3267_s3 + $0x1c0] sm:$0xff] }
  0x36   :  { %v3052_v34 = vld [vmem:[%s3266_s2] sm:$0xff] }
  0x37   :  { %1518 = vmatpush.bf16.msra.mxu1 %v2423_v43  ;;  %1544 = vmatpush.bf16.msra.mxu3 %v2439_v45  ;;  %v59_v35 = vperm.slane %v3052_v34, 0  ;;  %v60_v36 = vperm.slane %v3052_v34, 1  ;;  %v61_v41 = vperm.slane %v3052_v34, 2  ;;  %v62_v42 = vperm.slane %v3052_v34, 3 }
  0x39   :  { %1506 = vmatpush.bf16.msra.mxu0 %v2414_v46  ;;  %1532 = vmatpush.bf16.msra.mxu2 %v2430_v48 }
  0x3b   :  { %1519 = vmatpush.bf16.msra.mxu1 %v2422_v47  ;;  %1545 = vmatpush.bf16.msra.mxu3 %v2438_v49 }
  0x3c   :  { %1873 = vmatmul.msk.bf16.vlgmr.msrb.gmra.mxu0 %vm251_vm0, %v2679_v23  ;;  %1875 = vmatmul.msk.bf16.vlgmr.msrb.gmra.mxu2 %vm251_vm0, %v2679_v23 }
  0x3d   :  { %1507 = vmatpush.bf16.msra.mxu0 %v2413_v50  ;;  %1533 = vmatpush.bf16.msra.mxu2 %v2429_v52  ;;  %v2481_v50 = vld [vmem:[%s3267_s3 + $0x238] sm:$0xff] }
  0x3e   :  { %1874 = vmatmul.msk.bf16.vlgmr.msrb.gmra.mxu1 %vm251_vm0, %v2679_v23  ;;  %1876 = vmatmul.msk.bf16.vlgmr.msrb.gmra.mxu3 %vm251_vm0, %v2679_v23  ;;  %v2436_v23 = vld [vmem:[%s3267_s3 + $0xd0] sm:$0xff] }
  0x3f   :  { %1520 = vmatpush.bf16.msra.mxu1 %v2421_v51  ;;  %1546 = vmatpush.bf16.msra.mxu3 %v2437_v53  ;;  %v2489_v53 = vld [vmem:[%s3267_s3 + $0x278] sm:$0xff] }
  0x41   :  { %1508 = vmatpush.bf16.msra.mxu0 %v2412_v54  ;;  %1534 = vmatpush.bf16.msra.mxu2 %v2428_v56  ;;  %v2480_v56 = vld [vmem:[%s3267_s3 + $0x230] sm:$0xff] }
  0x43   :  { %1521 = vmatpush.bf16.msra.mxu1 %v2420_v55  ;;  %1547 = vmatpush.bf16.msra.mxu3 %v2436_v23  ;;  %v63_v55 = vperm.slane %v3052_v34, 4  ;;  %v64_v23 = vperm.slane %v3052_v34, 5 }
  0x45   :  { %1509 = vmatpush.bf16.msra.mxu0 %v2411_v57  ;;  %1535 = vmatpush.bf16.msra.mxu2 %v2427_v59  ;;  %v2488_v57 = vld [vmem:[%s3267_s3 + $0x270] sm:$0xff] }
  0x47   :  { %1522 = vmatpush.bf16.msra.mxu1 %v2419_v58  ;;  %1548 = vmatpush.bf16.msra.mxu3 %v2435_v60 }
  0x49   :  { %1510 = vmatpush.bf16.msra.mxu0 %v2410_v61  ;;  %1536 = vmatpush.bf16.msra.mxu2 %v2426_v1 }
  0x4b   :  { %1523 = vmatpush.bf16.msra.mxu1 %v2418_v63  ;;  %1549 = vmatpush.bf16.msra.mxu3 %v2434_v3  ;;  %v2479_v3 = vld [vmem:[%s3267_s3 + $0x228] sm:$0xff] }
  0x4d   :  { %1555 = vmatpush.bf16.msrb.mxu0 %v2449_v62  ;;  %1581 = vmatpush.bf16.msrb.mxu2 %v2465_v2  ;;  %v2497_v62 = vld [vmem:[%s3267_s3 + $0x2b8] sm:$0xff] }
  0x4f   :  { %1568 = vmatpush.bf16.msrb.mxu1 %v2457_v0  ;;  %1594 = vmatpush.bf16.msrb.mxu3 %v2473_v4  ;;  %v2505_v4 = vld [vmem:[%s3267_s3 + $0x2f8] sm:$0xff] }
  0x51   :  { %1556 = vmatpush.bf16.msrb.mxu0 %v2448_v5  ;;  %1582 = vmatpush.bf16.msrb.mxu2 %v2464_v7  ;;  %v2487_v7 = vld [vmem:[%s3267_s3 + $0x268] sm:$0xff] }
  0x53   :  { %1569 = vmatpush.bf16.msrb.mxu1 %v2456_v6  ;;  %1595 = vmatpush.bf16.msrb.mxu3 %v2472_v8  ;;  %v65_v8 = vperm.slane %v3052_v34, 6 }
  0x55   :  { %1557 = vmatpush.bf16.msrb.mxu0 %v2447_v9  ;;  %1583 = vmatpush.bf16.msrb.mxu2 %v2463_v11  ;;  %v2496_v9 = vld [vmem:[%s3267_s3 + $0x2b0] sm:$0xff]  ;;  %v2478_v11 = vld [vmem:[%s3267_s3 + $0x220] sm:$0xff] }
  0x57   :  { %1570 = vmatpush.bf16.msrb.mxu1 %v2455_v10  ;;  %1596 = vmatpush.bf16.msrb.mxu3 %v2471_v15  ;;  %v66_v10 = vperm.slane %v3052_v34, 7 }
  0x59   :  { %1558 = vmatpush.bf16.msrb.mxu0 %v2446_v12  ;;  %1584 = vmatpush.bf16.msrb.mxu2 %v2462_v17  ;;  %v2504_v12 = vld [vmem:[%s3267_s3 + $0x2f0] sm:$0xff] }
  0x5b   :  { %1571 = vmatpush.bf16.msrb.mxu1 %v2454_v13  ;;  %1597 = vmatpush.bf16.msrb.mxu3 %v2470_v19  ;;  %v2486_v13 = vld [vmem:[%s3267_s3 + $0x260] sm:$0xff] }
  0x5d   :  { %1559 = vmatpush.bf16.msrb.mxu0 %v2445_v14  ;;  %1585 = vmatpush.bf16.msrb.mxu2 %v2461_v21 }
  0x5f   :  { %1572 = vmatpush.bf16.msrb.mxu1 %v2453_v16  ;;  %1598 = vmatpush.bf16.msrb.mxu3 %v2469_v24  ;;  %v2503_v24 = vld [vmem:[%s3267_s3 + $0x2e8] sm:$0xff] }
  0x61   :  { %1560 = vmatpush.bf16.msrb.mxu0 %v2444_v18  ;;  %1586 = vmatpush.bf16.msrb.mxu2 %v2460_v26  ;;  %v2495_v18 = vld [vmem:[%s3267_s3 + $0x2a8] sm:$0xff] }
  0x63   :  { %1573 = vmatpush.bf16.msrb.mxu1 %v2452_v20  ;;  %1599 = vmatpush.bf16.msrb.mxu3 %v2468_v28 }
  0x65   :  { %1561 = vmatpush.bf16.msrb.mxu0 %v2443_v22  ;;  %1587 = vmatpush.bf16.msrb.mxu2 %v2459_v30  ;;  %v2477_v22 = vld [vmem:[%s3267_s3 + $0x218] sm:$0xff]  ;;  %v2494_v30 = vld [vmem:[%s3267_s3 + $0x2a0] sm:$0xff] }
  0x67   :  { %1574 = vmatpush.bf16.msrb.mxu1 %v2451_v25  ;;  %1600 = vmatpush.bf16.msrb.mxu3 %v2467_v31 }
  0x69   :  { %1562 = vmatpush.bf16.msrb.mxu0 %v2442_v27  ;;  %1588 = vmatpush.bf16.msrb.mxu2 %v2458_v32  ;;  %v3110_v27 = vld [vmem:[%s3266_s2 + $0x8] sm:$0xff]  ;;  %v2476_v32 = vld [vmem:[%s3267_s3 + $0x210] sm:$0xff] }
  0x6a   :  { %v67_v31 = vperm.slane %v3110_v27, 0  ;;  %v68_v34 = vperm.slane %v3110_v27, 1 }
  0x6b   :  { %1575 = vmatpush.bf16.msrb.mxu1 %v2450_v29  ;;  %1601 = vmatpush.bf16.msrb.mxu3 %v2466_v33  ;;  %v2485_v29 = vld [vmem:[%s3267_s3 + $0x258] sm:$0xff]  ;;  %v2502_v33 = vld [vmem:[%s3267_s3 + $0x2e0] sm:$0xff] }
  0x89   :  { %v264_v37 = vpop.f32.mrf.mxu0 }
  0x8a   :  { %v265_v38 = vadd.f32 %v264_v37, %v59_v35 }
  0x8b   :  { %v277_v39 = vpop.f32.mrf.mxu1 }
  0x8c   :  { %v278_v40 = vadd.f32 %v277_v39, %v60_v36  ;;  %2537 = vtanh.f32 %v265_v38  ;;  %v2484_v36 = vld [vmem:[%s3267_s3 + $0x250] sm:$0xff] }
  0x8e   :  { %2539 = vtanh.f32 %v278_v40  ;;  %v2493_v40 = vld [vmem:[%s3267_s3 + $0x298] sm:$0xff] }
  0x8f   :  { %v290_v43 = vpop.f32.mrf.mxu2 }
  0x90   :  { %v291_v44 = vadd.f32 %v290_v43, %v61_v41 }
  0x91   :  { %v266_v45 = vpop.f32.mrf.mxu0  ;;  %v303_v46 = vpop.f32.mrf.mxu3 }
  0x92   :  { %v2538_v47 = vpop.eup %2537  ;;  %v304_v48 = vadd.f32 %v303_v46, %v62_v42  ;;  %2541 = vtanh.f32 %v291_v44  ;;  %v2475_v45 = vld [vmem:[%s3267_s3 + $0x208] sm:$0xff]  ;;  %v2501_v46 = vld [vmem:[%s3267_s3 + $0x2d8] sm:$0xff] }
  0x93   :  { %v279_v49 = vpop.f32.mrf.mxu1  ;;  %v479_v52 = vpack.c.bf16 %v2538_v47, %v2538_v47 }
  0x94   :  { %v2540_v51 = vpop.eup %2539  ;;  %2543 = vtanh.f32 %v304_v48  ;;  %v2483_v49 = vld [vmem:[%s3267_s3 + $0x248] sm:$0xff] }
  0x95   :  { %v480_v54 = vpack.c.bf16 %v2540_v51, %v2540_v51  ;;  %1511 = vmatmul.bf16.vlgmr.msra.gmra.mxu0 %v479_v52  ;;  %v2492_v51 = vld [vmem:[%s3267_s3 + $0x290] sm:$0xff]  ;;  %v70_v52 = vperm.slane %v3110_v27, 3 }
  0x96   :  { %1607 = vmatpush.bf16.msra.mxu0 %v2481_v50  ;;  %v69_v50 = vperm.slane %v3110_v27, 2 }
  0x97   :  { %1524 = vmatmul.bf16.vlgmr.msra.gmra.mxu1 %v480_v54  ;;  %v292_v58 = vpop.f32.mrf.mxu2  ;;  %v2500_v54 = vld [vmem:[%s3267_s3 + $0x2d0] sm:$0xff] }
  0x98   :  { %1620 = vmatpush.bf16.msra.mxu1 %v2489_v53  ;;  %v2542_v59 = vpop.eup %2541  ;;  %v2474_v53 = vld [vmem:[%s3267_s3 + $0x200] sm:$0xff] }
  0x99   :  { %v305_v60 = vpop.f32.mrf.mxu3  ;;  %v316_v61 = vpop.f32.mrf.mxu0  ;;  %v481_v0 = vpack.c.bf16 %v2542_v59, %v2542_v59  ;;  %v2491_v59 = vld [vmem:[%s3267_s3 + $0x288] sm:$0xff] }
  0x9a   :  { %v2544_v63 = vpop.eup %2543  ;;  %v317_v1 = vadd.f32 %v316_v61, %v63_v55  ;;  %1608 = vmatpush.bf16.msra.mxu0 %v2480_v56  ;;  %v2513_v55 = vld [vmem:[%s3267_s3 + $0x338] sm:$0xff] }
  0x9b   :  { %v329_v2 = vpop.f32.mrf.mxu1  ;;  %v482_v5 = vpack.c.bf16 %v2544_v63, %v2544_v63  ;;  %1537 = vmatmul.bf16.vlgmr.msra.gmra.mxu2 %v481_v0  ;;  %v2521_v60 = vld [vmem:[%s3267_s3 + $0x378] sm:$0xff]  ;;  %v2499_v0 = vld [vmem:[%s3267_s3 + $0x2c8] sm:$0xff] }
  0x9c   :  { %v330_v6 = vadd.f32 %v329_v2, %v64_v23  ;;  %1621 = vmatpush.bf16.msra.mxu1 %v2488_v57  ;;  %2545 = vtanh.f32 %v317_v1  ;;  %1633 = vmatpush.bf16.msra.mxu2 %v2497_v62  ;;  %v2482_v23 = vld [vmem:[%s3267_s3 + $0x240] sm:$0xff] }
  0x9d   :  { %1550 = vmatmul.bf16.vlgmr.msra.gmra.mxu3 %v482_v5 }
  0x9e   :  { %2547 = vtanh.f32 %v330_v6  ;;  %1609 = vmatpush.bf16.msra.mxu0 %v2479_v3  ;;  %1646 = vmatpush.bf16.msra.mxu3 %v2505_v4  ;;  %v2512_v4 = vld [vmem:[%s3267_s3 + $0x330] sm:$0xff]  ;;  %v2490_v6 = vld [vmem:[%s3267_s3 + $0x280] sm:$0xff] }
  0x9f   :  { %v342_v14 = vpop.f32.mrf.mxu2 }
  0xa0   :  { %1622 = vmatpush.bf16.msra.mxu1 %v2487_v7  ;;  %v343_v15 = vadd.f32 %v342_v14, %v65_v8  ;;  %1634 = vmatpush.bf16.msra.mxu2 %v2496_v9  ;;  %v2520_v7 = vld [vmem:[%s3267_s3 + $0x370] sm:$0xff]  ;;  %v2529_v8 = vld [vmem:[%s3267_s3 + $0x3b8] sm:$0xff]  ;;  %v2498_v9 = vld [vmem:[%s3267_s3 + $0x2c0] sm:$0xff] }
  0xa1   :  { %v318_v16 = vpop.f32.mrf.mxu0  ;;  %v355_v17 = vpop.f32.mrf.mxu3  ;;  %v2519_v14 = vld [vmem:[%s3267_s3 + $0x368] sm:$0xff] }
  0xa2   :  { %v2546_v19 = vpop.eup %2545  ;;  %v356_v20 = vadd.f32 %v355_v17, %v66_v10  ;;  %1610 = vmatpush.bf16.msra.mxu0 %v2478_v11  ;;  %1647 = vmatpush.bf16.msra.mxu3 %v2504_v12  ;;  %2549 = vtanh.f32 %v343_v15  ;;  %v2511_v10 = vld [vmem:[%s3267_s3 + $0x328] sm:$0xff]  ;;  %v2534_v11 = vld [vmem:[%s3267_s3 + $0x3e0] sm:$0xff] }
  0xa3   :  { %v331_v21 = vpop.f32.mrf.mxu1  ;;  %v483_v26 = vpack.c.bf16 %v2546_v19, %v2546_v19  ;;  %v2528_v19 = vld [vmem:[%s3267_s3 + $0x3b0] sm:$0xff] }
  0xa4   :  { %v2548_v25 = vpop.eup %2547  ;;  %1623 = vmatpush.bf16.msra.mxu1 %v2486_v13  ;;  %2551 = vtanh.f32 %v356_v20  ;;  %1635 = vmatpush.bf16.msra.mxu2 %v2495_v18 }
  0xa5   :  { %v484_v28 = vpack.c.bf16 %v2548_v25, %v2548_v25  ;;  %1563 = vmatmul.bf16.vlgmr.msrb.gmra.mxu0 %v483_v26  ;;  %v2518_v25 = vld [vmem:[%s3267_s3 + $0x360] sm:$0xff]  ;;  %v71_v26 = vperm.slane %v3110_v27, 4 }
  0xa6   :  { %1611 = vmatpush.bf16.msra.mxu0 %v2477_v22  ;;  %1648 = vmatpush.bf16.msra.mxu3 %v2503_v24  ;;  %v2510_v22 = vld [vmem:[%s3267_s3 + $0x320] sm:$0xff]  ;;  %v2533_v24 = vld [vmem:[%s3267_s3 + $0x3d8] sm:$0xff] }
  0xa7   :  { %1576 = vmatmul.bf16.vlgmr.msrb.gmra.mxu1 %v484_v28  ;;  %v344_v35 = vpop.f32.mrf.mxu2  ;;  %v2527_v28 = vld [vmem:[%s3267_s3 + $0x3a8] sm:$0xff] }
  0xa8   :  { %1624 = vmatpush.bf16.msra.mxu1 %v2485_v29  ;;  %v2550_v37 = vpop.eup %2549  ;;  %1636 = vmatpush.bf16.msra.mxu2 %v2494_v30  ;;  %v74_v29 = vperm.slane %v3110_v27, 7  ;;  %v2509_v30 = vld [vmem:[%s3267_s3 + $0x318] sm:$0xff] }
  0xa9   :  { %v357_v38 = vpop.f32.mrf.mxu3  ;;  %v368_v39 = vpop.f32.mrf.mxu0  ;;  %v485_v42 = vpack.c.bf16 %v2550_v37, %v2550_v37 }
  0xaa   :  { %v2552_v41 = vpop.eup %2551  ;;  %v369_v43 = vadd.f32 %v368_v39, %v67_v31  ;;  %1612 = vmatpush.bf16.msra.mxu0 %v2476_v32  ;;  %1649 = vmatpush.bf16.msra.mxu3 %v2502_v33  ;;  %v2532_v31 = vld [vmem:[%s3267_s3 + $0x3d0] sm:$0xff]  ;;  %v72_v32 = vperm.slane %v3110_v27, 5  ;;  %v2526_v38 = vld [vmem:[%s3267_s3 + $0x3a0] sm:$0xff] }
  0xab   :  { %v381_v44 = vpop.f32.mrf.mxu1  ;;  %v486_v47 = vpack.c.bf16 %v2552_v41, %v2552_v41  ;;  %1589 = vmatmul.bf16.vlgmr.msrb.gmra.mxu2 %v485_v42  ;;  %v2508_v41 = vld [vmem:[%s3267_s3 + $0x310] sm:$0xff] }
  0xac   :  { %v382_v48 = vadd.f32 %v381_v44, %v68_v34  ;;  %2553 = vtanh.f32 %v369_v43  ;;  %1625 = vmatpush.bf16.msra.mxu1 %v2484_v36  ;;  %1637 = vmatpush.bf16.msra.mxu2 %v2493_v40  ;;  %v2517_v34 = vld [vmem:[%s3267_s3 + $0x358] sm:$0xff]  ;;  %v2531_v43 = vld [vmem:[%s3267_s3 + $0x3c8] sm:$0xff]  ;;  %v73_v44 = vperm.slane %v3110_v27, 6  ;;  %v2530_v27 = vld [vmem:[%s3267_s3 + $0x3c0] sm:$0xff] }
  0xad   :  { %1602 = vmatmul.bf16.vlgmr.msrb.gmra.mxu3 %v486_v47  ;;  %v2507_v47 = vld [vmem:[%s3267_s3 + $0x308] sm:$0xff] }
  0xae   :  { %2555 = vtanh.f32 %v382_v48  ;;  %1613 = vmatpush.bf16.msra.mxu0 %v2475_v45  ;;  %1650 = vmatpush.bf16.msra.mxu3 %v2501_v46  ;;  %v2516_v45 = vld [vmem:[%s3267_s3 + $0x350] sm:$0xff]  ;;  %v2525_v46 = vld [vmem:[%s3267_s3 + $0x398] sm:$0xff] }
  0xaf   :  { %v394_v56 = vpop.f32.mrf.mxu2 }
  0xb0   :  { %1626 = vmatpush.bf16.msra.mxu1 %v2483_v49  ;;  %v395_v57 = vadd.f32 %v394_v56, %v69_v50  ;;  %1638 = vmatpush.bf16.msra.mxu2 %v2492_v51  ;;  %v2515_v50 = vld [vmem:[%s3267_s3 + $0x348] sm:$0xff]  ;;  %v2506_v56 = vld [vmem:[%s3267_s3 + $0x300] sm:$0xff] }
  0xb1   :  { %v407_v58 = vpop.f32.mrf.mxu3  ;;  %v370_v61 = vpop.f32.mrf.mxu0 }
  0xb2   :  { %v2554_v62 = vpop.eup %2553  ;;  %v408_v63 = vadd.f32 %v407_v58, %v70_v52  ;;  %1614 = vmatpush.bf16.msra.mxu0 %v2474_v53  ;;  %1651 = vmatpush.bf16.msra.mxu3 %v2500_v54  ;;  %2557 = vtanh.f32 %v395_v57  ;;  %v2524_v53 = vld [vmem:[%s3267_s3 + $0x390] sm:$0xff]  ;;  %v2514_v57 = vld [vmem:[%s3267_s3 + $0x340] sm:$0xff] }
  0xb3   :  { %v383_v1 = vpop.f32.mrf.mxu1  ;;  %v487_v3 = vpack.c.bf16 %v2554_v62, %v2554_v62  ;;  %v2522_v62 = vld [vmem:[%s3267_s3 + $0x380] sm:$0xff] }
  0xb4   :  { %v2556_v2 = vpop.eup %2555  ;;  %2559 = vtanh.f32 %v408_v63  ;;  %1627 = vmatpush.bf16.msra.mxu1 %v2482_v23  ;;  %1639 = vmatpush.bf16.msra.mxu2 %v2491_v59  ;;  %v2523_v59 = vld [vmem:[%s3267_s3 + $0x388] sm:$0xff]  ;;  %s2597_s3 = smov [#allocation2]  }
  0xb5   :  { %v488_v5 = vpack.c.bf16 %v2556_v2, %v2556_v2  ;;  %1615 = vmatmul.bf16.vlgmr.msra.gmra.mxu0 %v487_v3 }
  0xb6   :  { %1659 = vmatpush.bf16.msrb.mxu0 %v2513_v55  ;;  %1652 = vmatpush.bf16.msra.mxu3 %v2499_v0 }
  0xb7   :  { %1628 = vmatmul.bf16.vlgmr.msra.gmra.mxu1 %v488_v5  ;;  %v396_v12 = vpop.f32.mrf.mxu2 }
  0xb8   :  { %1672 = vmatpush.bf16.msrb.mxu1 %v2521_v60  ;;  %v2558_v13 = vpop.eup %2557  ;;  %1640 = vmatpush.bf16.msra.mxu2 %v2490_v6 }
  0xb9   :  { %v409_v15 = vpop.f32.mrf.mxu3  ;;  %v420_v16 = vpop.f32.mrf.mxu0  ;;  %v489_v18 = vpack.c.bf16 %v2558_v13, %v2558_v13 }
  0xba   :  { %1660 = vmatpush.bf16.msrb.mxu0 %v2512_v4  ;;  %v2560_v17 = vpop.eup %2559  ;;  %1653 = vmatpush.bf16.msra.mxu3 %v2498_v9  ;;  %v421_v35 = vadd.f32 %v420_v16, %v71_v26 }
  0xbb   :  { %v433_v20 = vpop.f32.mrf.mxu1  ;;  %v490_v21 = vpack.c.bf16 %v2560_v17, %v2560_v17  ;;  %1641 = vmatmul.bf16.vlgmr.msra.gmra.mxu2 %v489_v18 }
  0xbc   :  { %1673 = vmatpush.bf16.msrb.mxu1 %v2520_v7  ;;  %1685 = vmatpush.bf16.msrb.mxu2 %v2529_v8  ;;  %v434_v42 = vadd.f32 %v433_v20, %v72_v32 }
  0xbd   :  { %1654 = vmatmul.bf16.vlgmr.msra.gmra.mxu3 %v490_v21 }
  0xbe   :  { %1661 = vmatpush.bf16.msrb.mxu0 %v2511_v10  ;;  %1701 = vmatpush.bf16.msrb.mxu3 %v2534_v11  ;;  %v2536_v10 = vld [vmem:[%s3268_s4] ss:$0 sm:$0xff]  ;;  %s1722_s4 = sshll.u32 %s2597_s3, 4  ;;  %s1723_s4 = int_to_ptr.vmem [resolvable:$true] %s1722_s4 }
  0xbf   :  { %v446_v33 = vpop.f32.mrf.mxu2 }
  0xc0   :  { %1674 = vmatpush.bf16.msrb.mxu1 %v2519_v14  ;;  %1686 = vmatpush.bf16.msrb.mxu2 %v2528_v19  ;;  %v447_v48 = vadd.f32 %v446_v33, %v73_v44 }
  0xc1   :  { %v459_v36 = vpop.f32.mrf.mxu3  ;;  %v422_v37 = vpop.f32.mrf.mxu0 }
  0xc2   :  { %1662 = vmatpush.bf16.msrb.mxu0 %v2510_v22  ;;  %1702 = vmatpush.bf16.msrb.mxu3 %v2533_v24  ;;  %v460_v39 = vadd.f32 %v459_v36, %v74_v29 }
  0xc3   :  { %v435_v40 = vpop.f32.mrf.mxu1 }
  0xc4   :  { %1675 = vmatpush.bf16.msrb.mxu1 %v2518_v25  ;;  %1687 = vmatpush.bf16.msrb.mxu2 %v2527_v28  ;;  %2561 = vtanh.f32 %v460_v39 }
  0xc5   :  { %2563 = vtanh.f32 %v421_v35 }
  0xc6   :  { %1663 = vmatpush.bf16.msrb.mxu0 %v2509_v30  ;;  %1703 = vmatpush.bf16.msrb.mxu3 %v2532_v31  ;;  %2565 = vtanh.f32 %v434_v42 }
  0xc7   :  { %v448_v49 = vpop.f32.mrf.mxu2  ;;  %2567 = vtanh.f32 %v447_v48 }
  0xc8   :  { %1676 = vmatpush.bf16.msrb.mxu1 %v2517_v34  ;;  %1688 = vmatpush.bf16.msrb.mxu2 %v2526_v38 }
  0xc9   :  { %v461_v51 = vpop.f32.mrf.mxu3 }
  0xca   :  { %1664 = vmatpush.bf16.msrb.mxu0 %v2508_v41  ;;  %1704 = vmatpush.bf16.msrb.mxu3 %v2531_v43  ;;  %v2562_v52 = vpop.eup %2561 }
  0xcb   :  { %v2564_v54 = vpop.eup %2563  ;;  %v494_v55 = vpack.c.bf16 %v2562_v52, %v2562_v52 }
  0xcc   :  { %1677 = vmatpush.bf16.msrb.mxu1 %v2516_v45  ;;  %1689 = vmatpush.bf16.msrb.mxu2 %v2525_v46  ;;  %v2566_v23 = vpop.eup %2565  ;;  %v491_v58 = vpack.c.bf16 %v2564_v54, %v2564_v54 }
  0xcd   :  { %v492_v60 = vpack.c.bf16 %v2566_v23, %v2566_v23  ;;  %v2568_v61 = vpop.eup %2567 }
  0xce   :  { %1665 = vmatpush.bf16.msrb.mxu0 %v2507_v47  ;;  %1705 = vmatpush.bf16.msrb.mxu3 %v2530_v27  ;;  %v493_v63 = vpack.c.bf16 %v2568_v61, %v2568_v61 }
  0xd0   :  { %1678 = vmatpush.bf16.msrb.mxu1 %v2515_v50  ;;  %1690 = vmatpush.bf16.msrb.mxu2 %v2524_v53 }
  0xd1   :  { %2377 = vmatmul.msk.bf16.vlgmr.msrb.gmra.mxu3 %vm1499_vm1, %v494_v55 }
  0xd2   :  { %1666 = vmatpush.bf16.msrb.mxu0 %v2506_v56 }
  0xd4   :  { %1679 = vmatpush.bf16.msrb.mxu1 %v2514_v57  ;;  %1691 = vmatpush.bf16.msrb.mxu2 %v2523_v59 }
  0xd5   :  { %1667 = vmatmul.bf16.vlgmr.msrb.gmra.mxu0 %v491_v58 }
  0xd7   :  { %1680 = vmatmul.bf16.vlgmr.msrb.gmra.mxu1 %v492_v60 }
  0xd8   :  { %1692 = vmatpush.bf16.msrb.mxu2 %v2522_v62 }
  0xdb   :  { %1693 = vmatmul.bf16.vlgmr.msrb.gmra.mxu2 %v493_v63 }
 0x112   :  { %v1512_v0 = vpop.f32.mrf.mxu0 }
 0x113   :  { %v1513_v13 = vadd.f32 %v2536_v10, %v1512_v0 }
 0x114   :  { %v1525_v1 = vpop.f32.mrf.mxu1 }
 0x115   :  { %v1526_v16 = vadd.f32 %v1525_v1, %v1513_v13 }
 0x11a   :  { %v1514_v2 = vpop.f32.mrf.mxu0 }
 0x11c   :  { %v1527_v3 = vpop.f32.mrf.mxu1 }
 0x11e   :  { %v1538_v4 = vpop.f32.mrf.mxu2 }
 0x11f   :  { %v1539_v19 = vadd.f32 %v1538_v4, %v1526_v16 }
 0x120   :  { %v1551_v5 = vpop.f32.mrf.mxu3 }
 0x121   :  { %v1552_v22 = vadd.f32 %v1551_v5, %v1539_v19 }
 0x122   :  { %v1564_v6 = vpop.f32.mrf.mxu0 }
 0x123   :  { %v1565_v26 = vadd.f32 %v1564_v6, %v1552_v22 }
 0x124   :  { %v1577_v7 = vpop.f32.mrf.mxu1 }
 0x125   :  { %v1578_v30 = vadd.f32 %v1577_v7, %v1565_v26 }
 0x126   :  { %v1540_v8 = vpop.f32.mrf.mxu2 }
 0x128   :  { %v1553_v9 = vpop.f32.mrf.mxu3 }
 0x12a   :  { %v1566_v11 = vpop.f32.mrf.mxu0 }
 0x12c   :  { %v1579_v12 = vpop.f32.mrf.mxu1 }
 0x12e   :  { %v1590_v14 = vpop.f32.mrf.mxu2 }
 0x12f   :  { %v1591_v31 = vadd.f32 %v1590_v14, %v1578_v30 }
 0x130   :  { %v1603_v15 = vpop.f32.mrf.mxu3 }
 0x131   :  { %v1604_v32 = vadd.f32 %v1603_v15, %v1591_v31 }
 0x132   :  { %v1616_v17 = vpop.f32.mrf.mxu0 }
 0x133   :  { %v1617_v35 = vadd.f32 %v1616_v17, %v1604_v32 }
 0x134   :  { %v1629_v18 = vpop.f32.mrf.mxu1 }
 0x135   :  { %v1630_v36 = vadd.f32 %v1629_v18, %v1617_v35 }
 0x136   :  { %v1592_v20 = vpop.f32.mrf.mxu2 }
 0x138   :  { %v1605_v21 = vpop.f32.mrf.mxu3 }
 0x13a   :  { %v1618_v24 = vpop.f32.mrf.mxu0 }
 0x13c   :  { %v1631_v25 = vpop.f32.mrf.mxu1 }
 0x13e   :  { %v1642_v28 = vpop.f32.mrf.mxu2 }
 0x13f   :  { %v1643_v38 = vadd.f32 %v1642_v28, %v1630_v36 }
 0x140   :  { %v1655_v29 = vpop.f32.mrf.mxu3 }
 0x141   :  { %v1656_v41 = vadd.f32 %v1655_v29, %v1643_v38 }
 0x146   :  { %v1644_v33 = vpop.f32.mrf.mxu2 }
 0x148   :  { %v1657_v34 = vpop.f32.mrf.mxu3 }
 0x152   :  { %v1668_v37 = vpop.f32.mrf.mxu0 }
 0x153   :  { %v1669_v42 = vadd.f32 %v1668_v37, %v1656_v41 }
 0x154   :  { %v1681_v39 = vpop.f32.mrf.mxu1  ;;  %v1707_v40 = vpop.f32.mrf.mxu3 }
 0x155   :  { %v1682_v46 = vadd.f32 %v1681_v39, %v1669_v42 }
 0x15a   :  { %v1670_v43 = vpop.f32.mrf.mxu0 }
 0x15c   :  { %v1683_v44 = vpop.f32.mrf.mxu1  ;;  %v1709_v45 = vpop.f32.mrf.mxu3 }
 0x15e   :  { %v1694_v47 = vpop.f32.mrf.mxu2 }
 0x15f   :  { %v1695_v27 = vadd.f32 %v1694_v47, %v1682_v46 }
 0x161   :  { %v1708_v48 = vadd.f32 %v1707_v40, %v1695_v27 }
 0x163   :  { %v1711_v49 = vmul.f32 0.5, %v1708_v48 }
 0x165   :  { %2569 = vtanh.f32 %v1711_v49 }
 0x166   :  { %v1696_v50 = vpop.f32.mrf.mxu2 }
 0x16b   :  { %v2570_v51 = vpop.eup %2569 }
 0x16c   :  { %v1713_v52 = vadd.f32 1.0, %v2570_v51 }
 0x16e   :  { %v1714_v53 = vmul.f32 0.5, %v1713_v52 }
 0x170   :  { %1716 = vst.msk [vmem:[#allocation2] sm:$0xff] %vm1715_vm2, %v1714_v53 }
 0x171   :  { %1727 = dma.vmem_to_hbm [thread:$0]  %s1723_s4, 128, %s1725_s29, [#allocation3]  }
 0x172   :  { %2595 = dma.done.wait [#allocation3], 128  }
 0x173   :  { %2596 = vsyncadd [#allocation3], 4294967168 }
 0x174   :  { %1732 = vsyncpa [#allocation3], 1 }

</bundles_post_ra>
